<compile_context>
chip_gen: v5e
topology: v5e:2x2
jax: 0.10.0
libtpu: 0.0.40
codegen_flags: <defaults>
</compile_context>

<pallas_src>
import functools
import math

import jax
import jax.numpy as jnp
from jax.experimental import pallas as pl
from jax.experimental.pallas import tpu as pltpu


_TILE_BYTES = 2 * 1024 * 1024    # target bytes per x block (per buffer)
_VMEM_LIMIT = 32 * 1024 * 1024   # explicit scoped-VMEM limit (safe on v5e/v6e/v7x)


def _round_up(x, m):
    return ((x + m - 1) // m) * m


def _round_down(x, m):
    return (x // m) * m


def _sublane_align(dtype):
    # Native packed sublane tile: 8 rows for 4-byte, 16 for 2-byte, 32 for 1-byte.
    return max(8, 32 // jnp.dtype(dtype).itemsize)


# ---------------------------------------------------------------------------
# Kernels
# ---------------------------------------------------------------------------

def _ln_channels_last_kernel(x_ref, w_ref, b_ref, o_ref, *, eps):
    # x_ref: (TM, C)   w_ref/b_ref: (1, C)   o_ref: (TM, C)
    x = x_ref[...].astype(jnp.float32)
    mean = jnp.mean(x, axis=-1, keepdims=True)
    xc = x - mean
    var = jnp.mean(xc * xc, axis=-1, keepdims=True)
    inv = jax.lax.rsqrt(var + eps)                       # EUP
    y = xc * inv * w_ref[...].astype(jnp.float32) + b_ref[...].astype(jnp.float32)
    o_ref[...] = y.astype(o_ref.dtype)


def _ln_channels_first_kernel(x_ref, w_ref, b_ref, o_ref, *, eps):
    # x_ref: (TB, C, TS)   w_ref/b_ref: (1, C, 1)   o_ref: (TB, C, TS)
    x = x_ref[...].astype(jnp.float32)
    mean = jnp.mean(x, axis=1, keepdims=True)            # reduce over channels
    xc = x - mean
    var = jnp.mean(xc * xc, axis=1, keepdims=True)
    inv = jax.lax.rsqrt(var + eps)                       # EUP
    y = xc * inv * w_ref[...].astype(jnp.float32) + b_ref[...].astype(jnp.float32)
    o_ref[...] = y.astype(o_ref.dtype)


# ---------------------------------------------------------------------------
# Wrappers
# ---------------------------------------------------------------------------

def layer_norm_channels_last(x, weight, bias, eps=1e-6):
    """x: (..., C); weight/bias: (C,). Normalizes over the last dim."""
    C = x.shape[-1]
    lead = x.shape[:-1]
    M = int(math.prod(lead)) if lead else 1
    x2 = x.reshape(M, C)
    w2 = weight.reshape(1, C)
    b2 = bias.reshape(1, C)

    itemsize = jnp.dtype(x.dtype).itemsize
    align = _sublane_align(x.dtype)

    # Rows per tile from the VMEM byte budget; keep >=2 grid steps when the
    # data allows it (v7x megacore); cdiv grid handles ragged M.
    tm_budget = max(align, _round_down(_TILE_BYTES // max(1, C * itemsize), align))
    tm_split = max(align, _round_up(pl.cdiv(M, 2), align))
    tm = min(tm_budget, tm_split)
    grid = (pl.cdiv(M, tm),)

    cost = pl.CostEstimate(
        flops=8 * M * C,
        transcendentals=M,
        bytes_accessed=(2 * M * C + 2 * C) * itemsize,
    )

    out = pl.pallas_call(
        functools.partial(_ln_channels_last_kernel, eps=eps),
        out_shape=jax.ShapeDtypeStruct((M, C), x.dtype),
        grid_spec=pltpu.PrefetchScalarGridSpec(
            num_scalar_prefetch=0,
            grid=grid,
            in_specs=[
                pl.BlockSpec((tm, C), lambda i: (i, 0)),
                pl.BlockSpec((1, C), lambda i: (0, 0)),   # resident
                pl.BlockSpec((1, C), lambda i: (0, 0)),   # resident
            ],
            out_specs=pl.BlockSpec((tm, C), lambda i: (i, 0)),
        ),
        compiler_params=pltpu.CompilerParams(
            dimension_semantics=("parallel",),
            vmem_limit_bytes=_VMEM_LIMIT,
        ),
        cost_estimate=cost,
    )(x2, w2, b2)
    return out.reshape(x.shape)


def layer_norm_channels_first(x, weight, bias, eps=1e-6):
    """x: (B, C, *spatial); weight/bias: (C,). Normalizes over the channel dim."""
    B, C = x.shape[0], x.shape[1]
    S = int(math.prod(x.shape[2:])) if x.ndim > 2 else 1
    x3 = x.reshape(B, C, S)           # contiguous reshape, no HBM transpose
    w3 = weight.reshape(1, C, 1)
    b3 = bias.reshape(1, C, 1)

    itemsize = jnp.dtype(x.dtype).itemsize

    # Lane-dense spatial tile (multiple of 128 when possible, never exceeding S),
    # then batch as many B rows per block as the byte budget allows.
    if S >= 128:
        ts_budget = max(128, _round_down(_TILE_BYTES // max(1, C * itemsize), 128))
        ts = min(ts_budget, _round_down(S, 128))
    else:
        ts = S                         # full-dim block satisfies the lane rule
    tb = max(1, _TILE_BYTES // max(1, C * ts * itemsize))
    tb = min(tb, B)

    # Keep >=2 grid steps total so both v7x TensorCores get work, if possible.
    if pl.cdiv(B, tb) * pl.cdiv(S, ts) < 2:
        if B >= 2:
            tb = pl.cdiv(B, 2)
        elif S >= 256:
            ts = max(128, _round_up(pl.cdiv(S, 2), 128))

    grid = (pl.cdiv(B, tb), pl.cdiv(S, ts))

    cost = pl.CostEstimate(
        flops=8 * B * C * S,
        transcendentals=B * S,
        bytes_accessed=(2 * B * C * S + 2 * C) * itemsize,
    )

    out = pl.pallas_call(
        functools.partial(_ln_channels_first_kernel, eps=eps),
        out_shape=jax.ShapeDtypeStruct((B, C, S), x.dtype),
        grid_spec=pltpu.PrefetchScalarGridSpec(
            num_scalar_prefetch=0,
            grid=grid,
            in_specs=[
                pl.BlockSpec((tb, C, ts), lambda b, s: (b, 0, s)),
                pl.BlockSpec((1, C, 1), lambda b, s: (0, 0, 0)),   # resident
                pl.BlockSpec((1, C, 1), lambda b, s: (0, 0, 0)),   # resident
            ],
            out_specs=pl.BlockSpec((tb, C, ts), lambda b, s: (b, 0, s)),
        ),
        compiler_params=pltpu.CompilerParams(
            dimension_semantics=("parallel", "parallel"),
            vmem_limit_bytes=_VMEM_LIMIT,
        ),
        cost_estimate=cost,
    )(x3, w3, b3)
    return out.reshape(x.shape)


def layer_norm(x, weight, bias, eps=1e-6, data_format="channels_last"):
    if data_format == "channels_last":
        return layer_norm_channels_last(x, weight, bias, eps)
    elif data_format == "channels_first":
        return layer_norm_channels_first(x, weight, bias, eps)
    else:
        raise NotImplementedError(data_format)


# ---------------------------------------------------------------------------
# Pure-JAX references (match the PyTorch forward exactly)
# ---------------------------------------------------------------------------

def _ref_channels_last(x, w, b, eps):
    mean = jnp.mean(x, axis=-1, keepdims=True)
    var = jnp.mean((x - mean) ** 2, axis=-1, keepdims=True)
    return (x - mean) / jnp.sqrt(var + eps) * w + b


def _ref_channels_first(x, w, b, eps):
    u = jnp.mean(x, axis=1, keepdims=True)
    s = jnp.mean((x - u) ** 2, axis=1, keepdims=True)
    xn = (x - u) / jnp.sqrt(s + eps)
    return w[None, :, None, None] * xn + b[None, :, None, None]


if __name__ == "__main__":
    key = jax.random.PRNGKey(0)
    ks = jax.random.split(key, 12)
    eps = 1e-6

    # ---- channels_last: x (B, H, W, C) = (2, 16, 16, 32)
    B, H, W, C_last = 2, 16, 16, 32
    x_last = jax.random.normal(ks[0], (B, H, W, C_last), dtype=jnp.float32)
    w_last = 1.0 + 0.1 * jax.random.normal(ks[1], (C_last,), dtype=jnp.float32)
    b_last = 0.1 * jax.random.normal(ks[2], (C_last,), dtype=jnp.float32)

    out_last = jax.block_until_ready(layer_norm(x_last, w_last, b_last, eps, "channels_last"))
    ref_last = _ref_channels_last(x_last, w_last, b_last, eps)
    assert out_last.shape == x_last.shape
    assert jnp.allclose(out_last, ref_last, atol=1e-5, rtol=1e-5)

    # ---- channels_last, ragged row count (exercises the cdiv / padded block path)
    x_rag = jax.random.normal(ks[3], (5, 13, C_last), dtype=jnp.float32)
    out_rag = jax.block_until_ready(layer_norm(x_rag, w_last, b_last, eps, "channels_last"))
    ref_rag = _ref_channels_last(x_rag, w_last, b_last, eps)
    assert jnp.allclose(out_rag, ref_rag, atol=1e-5, rtol=1e-5)

    # ---- channels_first: x (B, C, H, W) = (2, 4, 16, 16)
    C_first = 4
    x_first = jax.random.normal(ks[4], (B, C_first, H, W), dtype=jnp.float32)
    w_first = 1.0 + 0.1 * jax.random.normal(ks[5], (C_first,), dtype=jnp.float32)
    b_first = 0.1 * jax.random.normal(ks[6], (C_first,), dtype=jnp.float32)

    out_first = jax.block_until_ready(layer_norm(x_first, w_first, b_first, eps, "channels_first"))
    ref_first = _ref_channels_first(x_first, w_first, b_first, eps)
    assert out_first.shape == x_first.shape
    assert jnp.allclose(out_first, ref_first, atol=1e-5, rtol=1e-5)

    # ---- channels_first, ragged spatial size (S=200, not a multiple of 128)
    x_f_rag = jax.random.normal(ks[7], (2, C_first, 20, 10), dtype=jnp.float32)
    out_f_rag = jax.block_until_ready(layer_norm(x_f_rag, w_first, b_first, eps, "channels_first"))
    ref_f_rag = _ref_channels_first(x_f_rag, w_first, b_first, eps)
    assert jnp.allclose(out_f_rag, ref_f_rag, atol=1e-5, rtol=1e-5)

    print("KERNEL_OK")
</pallas_src>

<mosaic_0001>
module attributes {stable_mosaic.version = 11 : i64} {
  func.func @_ln_channels_last_kernel(%arg0: i32, %arg1: memref<256x32xf32, #tpu.memory_space<vmem>>, %arg2: memref<1x32xf32, #tpu.memory_space<vmem>>, %arg3: memref<1x32xf32, #tpu.memory_space<vmem>>, %arg4: memref<256x32xf32, #tpu.memory_space<vmem>>) attributes {dimension_semantics = [#tpu.dimension_semantics<parallel>], iteration_bounds = array<i64: 2>, scalar_prefetch = 0 : i64, scratch_operands = 0 : i64, tpu.core_type = #tpu.core_type<tc>, window_params = [{transform_indices = @transform_0, window_bounds = array<i64: 256, 32>}, {pipeline_mode = #tpu.pipeline_mode<synchronous>, transform_indices = @transform_1, window_bounds = array<i64: 1, 32>}, {pipeline_mode = #tpu.pipeline_mode<synchronous>, transform_indices = @transform_2, window_bounds = array<i64: 1, 32>}, {transform_indices = @transform_3, window_bounds = array<i64: 256, 32>}]} {
    %c0 = arith.constant 0 : index
    %c0_0 = arith.constant 0 : index
    %0 = vector.load %arg1[%c0, %c0_0] : memref<256x32xf32, #tpu.memory_space<vmem>>, vector<256x32xf32>
    %cst = arith.constant dense<0.000000e+00> : vector<256xf32>
    %1 = vector.multi_reduction <add>, %0, %cst [1] : vector<256x32xf32> to vector<256xf32>
    %2 = vector.shape_cast %1 : vector<256xf32> to vector<256x1xf32>
    %cst_1 = arith.constant 3.200000e+01 : f32
    %3 = vector.broadcast %cst_1 : f32 to vector<256x1xf32>
    %4 = arith.divf %2, %3 : vector<256x1xf32>
    %5 = vector.broadcast %4 : vector<256x1xf32> to vector<256x32xf32>
    %6 = arith.subf %0, %5 : vector<256x32xf32>
    %7 = arith.mulf %6, %6 : vector<256x32xf32>
    %cst_2 = arith.constant dense<0.000000e+00> : vector<256xf32>
    %8 = vector.multi_reduction <add>, %7, %cst_2 [1] : vector<256x32xf32> to vector<256xf32>
    %9 = vector.shape_cast %8 : vector<256xf32> to vector<256x1xf32>
    %cst_3 = arith.constant 3.200000e+01 : f32
    %10 = vector.broadcast %cst_3 : f32 to vector<256x1xf32>
    %11 = arith.divf %9, %10 : vector<256x1xf32>
    %cst_4 = arith.constant 9.99999997E-7 : f32
    %12 = vector.broadcast %cst_4 : f32 to vector<256x1xf32>
    %13 = arith.addf %11, %12 : vector<256x1xf32>
    %14 = math.rsqrt %13 : vector<256x1xf32>
    %15 = vector.broadcast %14 : vector<256x1xf32> to vector<256x32xf32>
    %16 = arith.mulf %6, %15 : vector<256x32xf32>
    %c0_5 = arith.constant 0 : index
    %c0_6 = arith.constant 0 : index
    %17 = vector.load %arg2[%c0_5, %c0_6] : memref<1x32xf32, #tpu.memory_space<vmem>>, vector<1x32xf32>
    %18 = vector.broadcast %17 : vector<1x32xf32> to vector<256x32xf32>
    %19 = arith.mulf %16, %18 : vector<256x32xf32>
    %c0_7 = arith.constant 0 : index
    %c0_8 = arith.constant 0 : index
    %20 = vector.load %arg3[%c0_7, %c0_8] : memref<1x32xf32, #tpu.memory_space<vmem>>, vector<1x32xf32>
    %21 = vector.broadcast %20 : vector<1x32xf32> to vector<256x32xf32>
    %22 = arith.addf %19, %21 : vector<256x32xf32>
    %c0_9 = arith.constant 0 : index
    %c0_10 = arith.constant 0 : index
    %23 = vector.load %arg4[%c0_9, %c0_10] : memref<256x32xf32, #tpu.memory_space<vmem>>, vector<256x32xf32>
    tpu.vector_store %arg4[%c0_9, %c0_10], %22 {strides = array<i32>} : memref<256x32xf32, #tpu.memory_space<vmem>>, vector<256x32xf32>,
    return
  }
  func.func @transform_0(%arg0: i32) -> (i32, i32) {
    %c0_i32 = arith.constant 0 : i32
    %c0_i32_0 = arith.constant 0 : i32
    return %arg0, %c0_i32 : i32, i32
  }
  func.func @transform_1(%arg0: i32) -> (i32, i32) {
    %c0_i32 = arith.constant 0 : i32
    %c0_i32_0 = arith.constant 0 : i32
    %c0_i32_1 = arith.constant 0 : i32
    return %c0_i32, %c0_i32_0 : i32, i32
  }
  func.func @transform_2(%arg0: i32) -> (i32, i32) {
    %c0_i32 = arith.constant 0 : i32
    %c0_i32_0 = arith.constant 0 : i32
    %c0_i32_1 = arith.constant 0 : i32
    return %c0_i32, %c0_i32_0 : i32, i32
  }
  func.func @transform_3(%arg0: i32) -> (i32, i32) {
    %c0_i32 = arith.constant 0 : i32
    %c0_i32_0 = arith.constant 0 : i32
    return %arg0, %c0_i32 : i32, i32
  }
}

</mosaic_0001>

<bundles_post_ra>
// kernel: tpu_custom_call.1
= control target key start
LH: loop header
LB: loop body
LE: loop exit
PB: predicated region body
PF: predicated region fallthrough
CT: control target
= control target key end

     0   :  { %s1197_s12 = smov 0   ;;  %s2276_s0 = inlined_call_operand.vmem [shape: f32[512,32], index: 0, kind: input, shape index: {}]   ;;  %s2277_s1 = inlined_call_operand.vmem [shape: f32[1,32], index: 1, kind: input, shape index: {}]   ;;  %s2278_s2 = inlined_call_operand.vmem [shape: f32[1,32], index: 2, kind: input, shape index: {}]   ;;  %s2279_s3 = inlined_call_operand.vmem [shape: f32[512,32], index: 3, kind: output, shape index: {}]  }
   0x1 LB: > { %s1078_s13 = sadd.s32 4294967295, %s1174_s12   ;;  %p1082_p0 = scmp.ge.s32.totalorder %s1174_s12, 1  ;;  %s1174_s12 = sphi %s1197_s12, %s13_s12  }
   0x2   : > { %p138_p1 = scmp.lt.s32.totalorder %s1174_s12, 3 }
   0x4   : > { %p139_p2 = pnand %p1082_p0, %p138_p1 }
   0x5   : > { %s1083_s14 = sshll.u32 (!%p139_p2), %s1078_s13, 5 }
   0x6   : > { %142 = sbr.rel (%p139_p2) target bundleno = 388 (0x184), region = 32  ;;  %p163_p3 = scmp.lt.s32.totalorder (!%p139_p2), %s1083_s14, 63 }
   0xb   : > { %s2301_s14 = smov (!%p163_p3, %s1083_s14), 63  ;;  %vm206_vm0 = vcmask 261120  }
   0xc   : > { %s1084_s15 = sshll.u32 %s2301_s14, 3 }
   0xd   : > { %s1213_s18 = scalar_lea.vmem %s2276_s0, %s1084_s15  ;;  %s1668_s25 = scalar_lea.vmem %s2279_s3, %s1084_s15 }
   0xe   : > { %v1216_v0 = vld [vmem:[%s1213_s18 + $0x20] sm:$0xff]  ;;  %v1219_v1 = vld [vmem:[%s1213_s18 + $0x10] sm:$0xff]  ;;  %v1231_v6 = vld [vmem:[%s1213_s18 + $0x28] sm:$0xff] }
   0xf   : > { %v1222_v2 = vld [vmem:[%s1213_s18] sm:$0xff]  ;;  %v219_v3 = vsel %vm206_vm0, %v1216_v0, 0.0  ;;  %v213_v4 = vsel %vm206_vm0, %v1219_v1, 0.0  ;;  %v1234_v7 = vld [vmem:[%s1213_s18 + $0x18] sm:$0xff]  ;;  %v1237_v8 = vld [vmem:[%s1213_s18 + $0x8] sm:$0xff]  ;;  %v222_v9 = vsel %vm206_vm0, %v1231_v6, 0.0 }
  0x10   : > { %v207_v5 = vsel %vm206_vm0, %v1222_v2, 0.0  ;;  %220 = vadd.xlane.f32.xlu2 %v219_v3  ;;  %214 = vadd.xlane.f32.xlu1 %v213_v4  ;;  %v216_v10 = vsel %vm206_vm0, %v1234_v7, 0.0  ;;  %v210_v11 = vsel %vm206_vm0, %v1237_v8, 0.0  ;;  %v1246_v12 = vld [vmem:[%s1213_s18 + $0x40] sm:$0xff]  ;;  %v1249_v13 = vld [vmem:[%s1213_s18 + $0x38] sm:$0xff]  ;;  %v1252_v14 = vld [vmem:[%s1213_s18 + $0x30] sm:$0xff] }
  0x11   : > { %208 = vadd.xlane.f32.xlu0 %v207_v5  ;;  %v231_v15 = vsel %vm206_vm0, %v1246_v12, 0.0  ;;  %v228_v16 = vsel %vm206_vm0, %v1249_v13, 0.0  ;;  %v225_v17 = vsel %vm206_vm0, %v1252_v14, 0.0  ;;  %v1261_v18 = vld [vmem:[%s1213_s18 + $0x58] sm:$0xff]  ;;  %v1264_v19 = vld [vmem:[%s1213_s18 + $0x50] sm:$0xff]  ;;  %v1267_v20 = vld [vmem:[%s1213_s18 + $0x48] sm:$0xff] }
  0x12   : > { %v240_v21 = vsel %vm206_vm0, %v1261_v18, 0.0  ;;  %v237_v22 = vsel %vm206_vm0, %v1264_v19, 0.0  ;;  %v234_v23 = vsel %vm206_vm0, %v1267_v20, 0.0  ;;  %v1276_v24 = vld [vmem:[%s1213_s18 + $0x70] sm:$0xff]  ;;  %v1279_v25 = vld [vmem:[%s1213_s18 + $0x68] sm:$0xff]  ;;  %v1282_v26 = vld [vmem:[%s1213_s18 + $0x60] sm:$0xff] }
  0x13   : > { %v249_v27 = vsel %vm206_vm0, %v1276_v24, 0.0  ;;  %v246_v28 = vsel %vm206_vm0, %v1279_v25, 0.0  ;;  %v243_v29 = vsel %vm206_vm0, %v1282_v26, 0.0  ;;  %v1291_v30 = vld [vmem:[%s1213_s18 + $0x88] sm:$0xff]  ;;  %v1294_v31 = vld [vmem:[%s1213_s18 + $0x80] sm:$0xff]  ;;  %v1297_v32 = vld [vmem:[%s1213_s18 + $0x78] sm:$0xff] }
  0x14   : > { %v258_v33 = vsel %vm206_vm0, %v1291_v30, 0.0  ;;  %v255_v34 = vsel %vm206_vm0, %v1294_v31, 0.0  ;;  %v252_v35 = vsel %vm206_vm0, %v1297_v32, 0.0  ;;  %v1306_v36 = vld [vmem:[%s1213_s18 + $0xa0] sm:$0xff]  ;;  %v1309_v37 = vld [vmem:[%s1213_s18 + $0x98] sm:$0xff]  ;;  %v1312_v38 = vld [vmem:[%s1213_s18 + $0x90] sm:$0xff] }
  0x15   : > { %v267_v39 = vsel %vm206_vm0, %v1306_v36, 0.0  ;;  %v264_v40 = vsel %vm206_vm0, %v1309_v37, 0.0  ;;  %v261_v41 = vsel %vm206_vm0, %v1312_v38, 0.0  ;;  %v1321_v42 = vld [vmem:[%s1213_s18 + $0xb8] sm:$0xff]  ;;  %v1324_v43 = vld [vmem:[%s1213_s18 + $0xb0] sm:$0xff]  ;;  %v1327_v44 = vld [vmem:[%s1213_s18 + $0xa8] sm:$0xff] }
  0x16   : > { %v276_v45 = vsel %vm206_vm0, %v1321_v42, 0.0  ;;  %v273_v46 = vsel %vm206_vm0, %v1324_v43, 0.0  ;;  %v270_v47 = vsel %vm206_vm0, %v1327_v44, 0.0  ;;  %v1336_v48 = vld [vmem:[%s1213_s18 + $0xd0] sm:$0xff]  ;;  %v1339_v49 = vld [vmem:[%s1213_s18 + $0xc8] sm:$0xff]  ;;  %v1342_v50 = vld [vmem:[%s1213_s18 + $0xc0] sm:$0xff] }
  0x17   : > { %v285_v51 = vsel %vm206_vm0, %v1336_v48, 0.0  ;;  %v282_v52 = vsel %vm206_vm0, %v1339_v49, 0.0  ;;  %v279_v53 = vsel %vm206_vm0, %v1342_v50, 0.0  ;;  %v1351_v54 = vld [vmem:[%s1213_s18 + $0xe8] sm:$0xff]  ;;  %v1354_v55 = vld [vmem:[%s1213_s18 + $0xe0] sm:$0xff]  ;;  %v1357_v56 = vld [vmem:[%s1213_s18 + $0xd8] sm:$0xff] }
  0x18   : > { %223 = vadd.xlane.f32.xlu2 %v222_v9  ;;  %217 = vadd.xlane.f32.xlu1 %v216_v10  ;;  %v294_v57 = vsel %vm206_vm0, %v1351_v54, 0.0  ;;  %v291_v58 = vsel %vm206_vm0, %v1354_v55, 0.0  ;;  %v288_v59 = vsel %vm206_vm0, %v1357_v56, 0.0  ;;  %v1366_v60 = vld [vmem:[%s1213_s18 + $0xf8] sm:$0xff]  ;;  %v1369_v61 = vld [vmem:[%s1213_s18 + $0xf0] sm:$0xff]  ;;  %v1176_v3 = vmov 32.0  }
  0x19   : > { %211 = vadd.xlane.f32.xlu0 %v210_v11  ;;  %v300_v62 = vsel %vm206_vm0, %v1366_v60, 0.0  ;;  %v297_v63 = vsel %vm206_vm0, %v1369_v61, 0.0  ;;  %1100 = vrcp.f32 %v1176_v3 }
  0x1f   : > { %v1101_v4 = vpop.eup %1100 }
  0x20   : > { %232 = vadd.xlane.f32.xlu2 %v231_v15  ;;  %229 = vadd.xlane.f32.xlu1 %v228_v16  ;;  %v304_v5 = vmul.f32 32.0, %v1101_v4  ;;  %vm308_vm1 = vweird.f32 %v1101_v4 }
  0x21   : > { %226 = vadd.xlane.f32.xlu0 %v225_v17 }
  0x22   : > { %v305_v9 = vsub.f32 1.0, %v304_v5 }
  0x24   : > { %v306_v10 = vmul.f32 %v1101_v4, %v305_v9 }
  0x26   : > { %v307_v11 = vadd.f32 %v1101_v4, %v306_v10 }
  0x28   : > { %241 = vadd.xlane.f32.xlu2 %v240_v21  ;;  %238 = vadd.xlane.f32.xlu1 %v237_v22  ;;  %v1375_v15 = vsel %vm308_vm1, %v1101_v4, %v307_v11 }
  0x29   : > { %235 = vadd.xlane.f32.xlu0 %v234_v23 }
  0x30   : > { %250 = vadd.xlane.f32.xlu2 %v249_v27  ;;  %247 = vadd.xlane.f32.xlu1 %v246_v28 }
  0x31   : > { %244 = vadd.xlane.f32.xlu0 %v243_v29 }
  0x38   : > { %259 = vadd.xlane.f32.xlu2 %v258_v33  ;;  %256 = vadd.xlane.f32.xlu1 %v255_v34 }
  0x39   : > { %253 = vadd.xlane.f32.xlu0 %v252_v35 }
  0x40   : > { %268 = vadd.xlane.f32.xlu2 %v267_v39  ;;  %265 = vadd.xlane.f32.xlu1 %v264_v40 }
  0x41   : > { %262 = vadd.xlane.f32.xlu0 %v261_v41 }
  0x48   : > { %277 = vadd.xlane.f32.xlu2 %v276_v45  ;;  %274 = vadd.xlane.f32.xlu1 %v273_v46 }
  0x49   : > { %271 = vadd.xlane.f32.xlu0 %v270_v47 }
  0x50   : > { %286 = vadd.xlane.f32.xlu2 %v285_v51  ;;  %283 = vadd.xlane.f32.xlu1 %v282_v52 }
  0x51   : > { %280 = vadd.xlane.f32.xlu0 %v279_v53 }
  0x58   : > { %295 = vadd.xlane.f32.xlu2 %v294_v57  ;;  %292 = vadd.xlane.f32.xlu1 %v291_v58 }
  0x59   : > { %289 = vadd.xlane.f32.xlu0 %v288_v59 }
  0x60   : > { %301 = vadd.xlane.f32.xlu1 %v300_v62 }
  0x61   : > { %298 = vadd.xlane.f32.xlu0 %v297_v63 }
  0x83   : > { %v221_v16 = vpop.xlane.xlu2 %220  ;;  %v215_v17 = vpop.xlane.xlu1 %214 }
  0x84   : > { %v312_v21 = vmul.f32 %v1375_v15, %v215_v17  ;;  %v209_v22 = vpop.xlane.xlu0 %208  ;;  %v314_v45 = vmul.f32 %v1375_v15, %v221_v16 }
  0x85   : > { %v310_v23 = vmul.f32 %v1375_v15, %v209_v22 }
  0x86   : > { %v1380_v27 = vsub.f32 %v1219_v1, %v312_v21  ;;  %v1409_v58 = vsub.f32 %v1216_v0, %v314_v45 }
  0x87   : > { %v1383_v28 = vsub.f32 %v1222_v2, %v310_v23 }
  0x88   : > { %v376_v29 = vmul.f32 %v1380_v27, %v1380_v27  ;;  %v378_v9 = vmul.f32 %v1409_v58, %v1409_v58 }
  0x89   : > { %v374_v33 = vmul.f32 %v1383_v28, %v1383_v28 }
  0x8a   : > { %v412_v34 = vsel %vm206_vm0, %v376_v29, 0.0  ;;  %v418_v21 = vsel %vm206_vm0, %v378_v9, 0.0 }
  0x8b   : > { %v224_v35 = vpop.xlane.xlu2 %223  ;;  %413 = vadd.xlane.f32.xlu1 %v412_v34  ;;  %v218_v39 = vpop.xlane.xlu1 %217  ;;  %v406_v40 = vsel %vm206_vm0, %v374_v33, 0.0 }
  0x8c   : > { %v315_v41 = vmul.f32 %v1375_v15, %v224_v35  ;;  %v313_v1 = vmul.f32 %v1375_v15, %v218_v39  ;;  %407 = vadd.xlane.f32.xlu2 %v406_v40  ;;  %v212_v2 = vpop.xlane.xlu0 %211 }
  0x8d   : > { %v311_v46 = vmul.f32 %v1375_v15, %v212_v2 }
  0x8e   : > { %v1396_v47 = vsub.f32 %v1231_v6, %v315_v41  ;;  %v1399_v51 = vsub.f32 %v1234_v7, %v313_v1 }
  0x8f   : > { %v1402_v52 = vsub.f32 %v1237_v8, %v311_v46 }
  0x90   : > { %v379_v53 = vmul.f32 %v1396_v47, %v1396_v47  ;;  %v377_v57 = vmul.f32 %v1399_v51, %v1399_v51 }
  0x91   : > { %v375_v59 = vmul.f32 %v1402_v52, %v1402_v52 }
  0x92   : > { %v421_v6 = vsel %vm206_vm0, %v379_v53, 0.0  ;;  %v415_v7 = vsel %vm206_vm0, %v377_v57, 0.0 }
  0x93   : > { %v233_v62 = vpop.xlane.xlu2 %232  ;;  %422 = vadd.xlane.f32.xlu1 %v421_v6  ;;  %v409_v8 = vsel %vm206_vm0, %v375_v59, 0.0  ;;  %v230_v63 = vpop.xlane.xlu1 %229 }
  0x94   : > { %v318_v3 = vmul.f32 %v1375_v15, %v233_v62  ;;  %416 = vadd.xlane.f32.xlu2 %v415_v7  ;;  %410 = vadd.xlane.f32.xlu0 %v409_v8  ;;  %v227_v4 = vpop.xlane.xlu0 %226  ;;  %v317_v5 = vmul.f32 %v1375_v15, %v230_v63 }
  0x95   : > { %v316_v0 = vmul.f32 %v1375_v15, %v227_v4 }
  0x96   : > { %v1422_v10 = vsub.f32 %v1246_v12, %v318_v3  ;;  %v1430_v17 = vsub.f32 %v1249_v13, %v317_v5 }
  0x97   : > { %v1425_v11 = vsub.f32 %v1252_v14, %v316_v0 }
  0x98   : > { %v382_v16 = vmul.f32 %v1422_v10, %v1422_v10  ;;  %v381_v39 = vmul.f32 %v1430_v17, %v1430_v17 }
  0x99   : > { %v380_v22 = vmul.f32 %v1425_v11, %v1425_v11 }
  0x9a   : > { %v430_v23 = vsel %vm206_vm0, %v382_v16, 0.0  ;;  %v427_v45 = vsel %vm206_vm0, %v381_v39, 0.0 }
  0x9b   : > { %v242_v29 = vpop.xlane.xlu2 %241  ;;  %431 = vadd.xlane.f32.xlu1 %v430_v23  ;;  %v424_v12 = vsel %vm206_vm0, %v380_v22, 0.0  ;;  %v239_v33 = vpop.xlane.xlu1 %238 }
  0x9c   : > { %v321_v14 = vmul.f32 %v1375_v15, %v242_v29  ;;  %419 = vadd.xlane.f32.xlu0 %v418_v21  ;;  %425 = vadd.xlane.f32.xlu2 %v424_v12  ;;  %v236_v34 = vpop.xlane.xlu0 %235  ;;  %v320_v35 = vmul.f32 %v1375_v15, %v239_v33 }
  0x9d   : > { %v319_v13 = vmul.f32 %v1375_v15, %v236_v34 }
  0x9e   : > { %v1443_v40 = vsub.f32 %v1261_v18, %v321_v14  ;;  %v1451_v2 = vsub.f32 %v1264_v19, %v320_v35 }
  0x9f   : > { %v1446_v41 = vsub.f32 %v1267_v20, %v319_v13 }
  0xa0   : > { %v385_v1 = vmul.f32 %v1443_v40, %v1443_v40  ;;  %v384_v62 = vmul.f32 %v1451_v2, %v1451_v2 }
  0xa1   : > { %v383_v46 = vmul.f32 %v1446_v41, %v1446_v41 }
  0xa2   : > { %v439_v53 = vsel %vm206_vm0, %v385_v1, 0.0  ;;  %v436_v0 = vsel %vm206_vm0, %v384_v62, 0.0 }
  0xa3   : > { %v251_v57 = vpop.xlane.xlu2 %250  ;;  %440 = vadd.xlane.f32.xlu1 %v439_v53  ;;  %v433_v18 = vsel %vm206_vm0, %v383_v46, 0.0  ;;  %v248_v59 = vpop.xlane.xlu1 %247 }
  0xa4   : > { %v324_v20 = vmul.f32 %v1375_v15, %v251_v57  ;;  %428 = vadd.xlane.f32.xlu0 %v427_v45  ;;  %434 = vadd.xlane.f32.xlu2 %v433_v18  ;;  %v245_v6 = vpop.xlane.xlu0 %244  ;;  %v323_v7 = vmul.f32 %v1375_v15, %v248_v59 }
  0xa5   : > { %v322_v19 = vmul.f32 %v1375_v15, %v245_v6 }
  0xa6   : > { %v1464_v8 = vsub.f32 %v1276_v24, %v324_v20  ;;  %v1472_v4 = vsub.f32 %v1279_v25, %v323_v7 }
  0xa7   : > { %v1467_v63 = vsub.f32 %v1282_v26, %v322_v19 }
  0xa8   : > { %v388_v3 = vmul.f32 %v1464_v8, %v1464_v8  ;;  %v387_v29 = vmul.f32 %v1472_v4, %v1472_v4 }
  0xa9   : > { %v386_v5 = vmul.f32 %v1467_v63, %v1467_v63 }
  0xaa   : > { %v448_v9 = vsel %vm206_vm0, %v388_v3, 0.0  ;;  %v445_v13 = vsel %vm206_vm0, %v387_v29, 0.0 }
  0xab   : > { %v260_v16 = vpop.xlane.xlu2 %259  ;;  %449 = vadd.xlane.f32.xlu1 %v448_v9  ;;  %v442_v24 = vsel %vm206_vm0, %v386_v5, 0.0  ;;  %v257_v21 = vpop.xlane.xlu1 %256 }
  0xac   : > { %v327_v26 = vmul.f32 %v1375_v15, %v260_v16  ;;  %437 = vadd.xlane.f32.xlu0 %v436_v0  ;;  %443 = vadd.xlane.f32.xlu2 %v442_v24  ;;  %v254_v22 = vpop.xlane.xlu0 %253  ;;  %v326_v23 = vmul.f32 %v1375_v15, %v257_v21 }
  0xad   : > { %v325_v25 = vmul.f32 %v1375_v15, %v254_v22 }
  0xae   : > { %v1485_v12 = vsub.f32 %v1291_v30, %v327_v26  ;;  %v1493_v34 = vsub.f32 %v1294_v31, %v326_v23 }
  0xaf   : > { %v1488_v33 = vsub.f32 %v1297_v32, %v325_v25 }
  0xb0   : > { %v391_v14 = vmul.f32 %v1485_v12, %v1485_v12  ;;  %v390_v57 = vmul.f32 %v1493_v34, %v1493_v34 }
  0xb1   : > { %v389_v35 = vmul.f32 %v1488_v33, %v1488_v33 }
  0xb2   : > { %v457_v39 = vsel %vm206_vm0, %v391_v14, 0.0  ;;  %v454_v19 = vsel %vm206_vm0, %v390_v57, 0.0 }
  0xb3   : > { %v269_v1 = vpop.xlane.xlu2 %268  ;;  %458 = vadd.xlane.f32.xlu1 %v457_v39  ;;  %v451_v30 = vsel %vm206_vm0, %v389_v35, 0.0  ;;  %v266_v45 = vpop.xlane.xlu1 %265 }
  0xb4   : > { %v330_v32 = vmul.f32 %v1375_v15, %v269_v1  ;;  %446 = vadd.xlane.f32.xlu0 %v445_v13  ;;  %452 = vadd.xlane.f32.xlu2 %v451_v30  ;;  %v263_v46 = vpop.xlane.xlu0 %262  ;;  %v329_v53 = vmul.f32 %v1375_v15, %v266_v45 }
  0xb5   : > { %v328_v31 = vmul.f32 %v1375_v15, %v263_v46 }
  0xb6   : > { %v1506_v18 = vsub.f32 %v1306_v36, %v330_v32  ;;  %v1514_v6 = vsub.f32 %v1309_v37, %v329_v53 }
  0xb7   : > { %v1509_v59 = vsub.f32 %v1312_v38, %v328_v31 }
  0xb8   : > { %v394_v20 = vmul.f32 %v1506_v18, %v1506_v18  ;;  %v393_v16 = vmul.f32 %v1514_v6, %v1514_v6 }
  0xb9   : > { %v392_v7 = vmul.f32 %v1509_v59, %v1509_v59 }
  0xba   : > { %v466_v62 = vsel %vm206_vm0, %v394_v20, 0.0  ;;  %v463_v25 = vsel %vm206_vm0, %v393_v16, 0.0 }
  0xbb   : > { %v278_v3 = vpop.xlane.xlu2 %277  ;;  %467 = vadd.xlane.f32.xlu1 %v466_v62  ;;  %v460_v36 = vsel %vm206_vm0, %v392_v7, 0.0  ;;  %v275_v0 = vpop.xlane.xlu1 %274 }
  0xbc   : > { %v333_v38 = vmul.f32 %v1375_v15, %v278_v3  ;;  %455 = vadd.xlane.f32.xlu0 %v454_v19  ;;  %461 = vadd.xlane.f32.xlu2 %v460_v36  ;;  %v272_v5 = vpop.xlane.xlu0 %271  ;;  %v332_v9 = vmul.f32 %v1375_v15, %v275_v0 }
  0xbd   : > { %v331_v37 = vmul.f32 %v1375_v15, %v272_v5 }
  0xbe   : > { %v1527_v24 = vsub.f32 %v1321_v42, %v333_v38  ;;  %v1535_v22 = vsub.f32 %v1324_v43, %v332_v9 }
  0xbf   : > { %v1530_v21 = vsub.f32 %v1327_v44, %v331_v37 }
  0xc0   : > { %v397_v26 = vmul.f32 %v1527_v24, %v1527_v24  ;;  %v396_v1 = vmul.f32 %v1535_v22, %v1535_v22 }
  0xc1   : > { %v395_v23 = vmul.f32 %v1530_v21, %v1530_v21 }
  0xc2   : > { %v475_v29 = vsel %vm206_vm0, %v397_v26, 0.0  ;;  %v472_v31 = vsel %vm206_vm0, %v396_v1, 0.0 }
  0xc3   : > { %v287_v14 = vpop.xlane.xlu2 %286  ;;  %476 = vadd.xlane.f32.xlu1 %v475_v29  ;;  %v469_v42 = vsel %vm206_vm0, %v395_v23, 0.0  ;;  %v284_v13 = vpop.xlane.xlu1 %283 }
  0xc4   : > { %v336_v44 = vmul.f32 %v1375_v15, %v287_v14  ;;  %464 = vadd.xlane.f32.xlu0 %v463_v25  ;;  %470 = vadd.xlane.f32.xlu2 %v469_v42  ;;  %v281_v35 = vpop.xlane.xlu0 %280  ;;  %v335_v39 = vmul.f32 %v1375_v15, %v284_v13 }
  0xc5   : > { %v334_v43 = vmul.f32 %v1375_v15, %v281_v35 }
  0xc6   : > { %v1548_v30 = vsub.f32 %v1336_v48, %v336_v44  ;;  %v1556_v46 = vsub.f32 %v1339_v49, %v335_v39 }
  0xc7   : > { %v1551_v45 = vsub.f32 %v1342_v50, %v334_v43 }
  0xc8   : > { %v400_v32 = vmul.f32 %v1548_v30, %v1548_v30  ;;  %v399_v3 = vmul.f32 %v1556_v46, %v1556_v46 }
  0xc9   : > { %v398_v53 = vmul.f32 %v1551_v45, %v1551_v45 }
  0xca   : > { %v484_v57 = vsel %vm206_vm0, %v400_v32, 0.0  ;;  %v481_v37 = vsel %vm206_vm0, %v399_v3, 0.0 }
  0xcb   : > { %v296_v20 = vpop.xlane.xlu2 %295  ;;  %485 = vadd.xlane.f32.xlu1 %v484_v57  ;;  %v478_v48 = vsel %vm206_vm0, %v398_v53, 0.0  ;;  %v293_v19 = vpop.xlane.xlu1 %292 }
  0xcc   : > { %v339_v50 = vmul.f32 %v1375_v15, %v296_v20  ;;  %473 = vadd.xlane.f32.xlu0 %v472_v31  ;;  %479 = vadd.xlane.f32.xlu2 %v478_v48  ;;  %v290_v7 = vpop.xlane.xlu0 %289  ;;  %v338_v62 = vmul.f32 %v1375_v15, %v293_v19 }
  0xcd   : > { %v337_v49 = vmul.f32 %v1375_v15, %v290_v7 }
  0xce   : > { %v1569_v36 = vsub.f32 %v1351_v54, %v339_v50  ;;  %v1577_v5 = vsub.f32 %v1354_v55, %v338_v62 }
  0xcf   : > { %v1572_v0 = vsub.f32 %v1357_v56, %v337_v49 }
  0xd0   : > { %v403_v38 = vmul.f32 %v1569_v36, %v1569_v36  ;;  %v402_v55 = vmul.f32 %v1577_v5, %v1577_v5 }
  0xd1   : > { %v401_v9 = vmul.f32 %v1572_v0, %v1572_v0 }
  0xd2   : > { %v493_v16 = vsel %vm206_vm0, %v403_v38, 0.0  ;;  %v490_v42 = vsel %vm206_vm0, %v402_v55, 0.0 }
  0xd3   : > { %494 = vadd.xlane.f32.xlu1 %v493_v16  ;;  %v487_v54 = vsel %vm206_vm0, %v401_v9, 0.0  ;;  %v302_v26 = vpop.xlane.xlu1 %301 }
  0xd4   : > { %482 = vadd.xlane.f32.xlu0 %v481_v37  ;;  %488 = vadd.xlane.f32.xlu2 %v487_v54  ;;  %v299_v56 = vpop.xlane.xlu0 %298  ;;  %v341_v23 = vmul.f32 %v1375_v15, %v302_v26 }
  0xd5   : > { %v340_v25 = vmul.f32 %v1375_v15, %v299_v56 }
  0xd6   : > { %v1592_v14 = vsub.f32 %v1366_v60, %v341_v23 }
  0xd7   : > { %v1589_v29 = vsub.f32 %v1369_v61, %v340_v25 }
  0xd8   : > { %v405_v35 = vmul.f32 %v1592_v14, %v1592_v14 }
  0xd9   : > { %v404_v13 = vmul.f32 %v1589_v29, %v1589_v29 }
  0xda   : > { %v499_v43 = vsel %vm206_vm0, %v405_v35, 0.0 }
  0xdb   : > { %v496_v44 = vsel %vm206_vm0, %v404_v13, 0.0 }
  0xdc   : > { %491 = vadd.xlane.f32.xlu0 %v490_v42  ;;  %497 = vadd.xlane.f32.xlu2 %v496_v44 }
  0xe4   : > { %500 = vadd.xlane.f32.xlu0 %v499_v43 }
  0xfe   : > { %v414_v61 = vpop.xlane.xlu1 %413 }
  0xff   : > { %v504_v39 = vmul.f32 %v414_v61, %v1375_v15  ;;  %v408_v60 = vpop.xlane.xlu2 %407 }
 0x100   : > { %v502_v1 = vmul.f32 %v408_v60, %v1375_v15 }
 0x101   : > { %v536_v32 = vadd.f32 1e-06, %v504_v39 }
 0x102   : > { %v534_v31 = vadd.f32 1e-06, %v502_v1 }
 0x103   : > { %1102 = vrsqrt.f32 %v536_v32  ;;  %vm592_vm2 = vweird.f32 %v536_v32 }
 0x104   : > { %1104 = vrsqrt.f32 %v534_v31  ;;  %vm572_vm4 = vweird.f32 %v534_v31 }
 0x106   : > { %v423_v53 = vpop.xlane.xlu1 %422 }
 0x107   : > { %v507_v57 = vmul.f32 %v423_v53, %v1375_v15  ;;  %v417_v20 = vpop.xlane.xlu2 %416  ;;  %v411_v48 = vpop.xlane.xlu0 %410 }
 0x108   : > { %v505_v19 = vmul.f32 %v417_v20, %v1375_v15  ;;  %v503_v50 = vmul.f32 %v411_v48, %v1375_v15  ;;  %v1634_v20 = vld [vmem:[%s2277_s1] ss:$0 sm:$0xff] }
 0x109   : > { %v1103_v7 = vpop.eup %1102  ;;  %v1606_v49 = vadd.f32 1e-06, %v507_v57 }
 0x10a   : > { %v1105_v62 = vpop.eup %1104  ;;  %v587_v3 = vmul.f32 %v1103_v7, %v536_v32  ;;  %v1608_v38 = vadd.f32 1e-06, %v505_v19  ;;  %v1610_v37 = vadd.f32 1e-06, %v503_v50  ;;  %vm593_vm3 = vweird.f32 %v1103_v7  ;;  %v1651_v32 = vld [vmem:[%s2278_s2] ss:$0 sm:$0xff] }
 0x10b   : > { %v567_v9 = vmul.f32 %v1105_v62, %v534_v31  ;;  %1106 = vrsqrt.f32 %v1606_v49  ;;  %vm573_vm5 = vweird.f32 %v1105_v62  ;;  %vm622_vm6 = vweird.f32 %v1606_v49  ;;  %vm594_vm8 = vmor %vm592_vm2, %vm593_vm3 }
 0x10c   : > { %v588_v16 = vmul.f32 %v1103_v7, %v587_v3  ;;  %1108 = vrsqrt.f32 %v1608_v38  ;;  %vm602_vm7 = vweird.f32 %v1608_v38  ;;  %vm574_vm9 = vmor %vm572_vm4, %vm573_vm5  ;;  %vm582_vm10 = vweird.f32 %v1610_v37 }
 0x10d   : > { %v568_v54 = vmul.f32 %v1105_v62, %v567_v9  ;;  %1110 = vrsqrt.f32 %v1610_v37 }
 0x10e   : > { %v589_v26 = vmul.f32 0.5, %v588_v16  ;;  %v432_v56 = vpop.xlane.xlu1 %431 }
 0x10f   : > { %v569_v25 = vmul.f32 0.5, %v568_v54  ;;  %v510_v23 = vmul.f32 %v432_v56, %v1375_v15  ;;  %v426_v55 = vpop.xlane.xlu2 %425  ;;  %v420_v42 = vpop.xlane.xlu0 %419 }
 0x110   : > { %v590_v13 = vsub.f32 1.5, %v589_v26  ;;  %v508_v44 = vmul.f32 %v426_v55, %v1375_v15  ;;  %v506_v50 = vmul.f32 %v420_v42, %v1375_v15 }
 0x111   : > { %v1617_v35 = vpop.eup %1106  ;;  %v570_v43 = vsub.f32 1.5, %v569_v25  ;;  %v1620_v61 = vadd.f32 1e-06, %v510_v23 }
 0x112   : > { %v1622_v39 = vpop.eup %1108  ;;  %v591_v60 = vmul.f32 %v1103_v7, %v590_v13  ;;  %v617_v1 = vmul.f32 %v1617_v35, %v1606_v49  ;;  %v1627_v53 = vadd.f32 1e-06, %v508_v44  ;;  %vm623_vm11 = vweird.f32 %v1617_v35 }
 0x113   : > { %v1629_v57 = vpop.eup %1110  ;;  %v571_v48 = vmul.f32 %v1105_v62, %v570_v43  ;;  %v597_v19 = vmul.f32 %v1622_v39, %v1608_v38  ;;  %1112 = vrsqrt.f32 %v1620_v61  ;;  %vm603_vm12 = vweird.f32 %v1622_v39  ;;  %vm1679_vm13 = vmor %vm622_vm6, %vm623_vm11 }
 0x114   : > { %v595_v3 = vsel %vm594_vm8, %v1103_v7, %v591_v60  ;;  %v618_v9 = vmul.f32 %v1617_v35, %v617_v1  ;;  %v577_v16 = vmul.f32 %v1629_v57, %v1610_v37  ;;  %1114 = vrsqrt.f32 %v1627_v53  ;;  %vm604_vm2 = vmor %vm602_vm7, %vm603_vm12 }
 0x115   : > { %v888_v54 = vmul.f32 %v595_v3, %v1380_v27  ;;  %v575_v26 = vsel %vm574_vm9, %v1105_v62, %v571_v48  ;;  %v598_v31 = vmul.f32 %v1622_v39, %v597_v19  ;;  %v1661_v13 = vadd.f32 1e-06, %v506_v50 }
 0x116   : > { %v886_v7 = vmul.f32 %v575_v26, %v1383_v28  ;;  %v619_v56 = vmul.f32 0.5, %v618_v9  ;;  %v578_v25 = vmul.f32 %v1629_v57, %v577_v16  ;;  %v441_v23 = vpop.xlane.xlu1 %440  ;;  %vm583_vm14 = vweird.f32 %v1629_v57 }
 0x117   : > { %v924_v55 = vmul.f32 %v1634_v20, %v888_v54  ;;  %v599_v42 = vmul.f32 0.5, %v598_v31  ;;  %v435_v27 = vpop.xlane.xlu2 %434  ;;  %v429_v62 = vpop.xlane.xlu0 %428  ;;  %v513_v60 = vmul.f32 %v441_v23, %v1375_v15  ;;  %1116 = vrsqrt.f32 %v1661_v13  ;;  %vm584_vm3 = vmor %vm582_vm10, %vm583_vm14 }
 0x118   : > { %v922_v28 = vmul.f32 %v1634_v20, %v886_v7  ;;  %v620_v44 = vsub.f32 1.5, %v619_v56  ;;  %v579_v43 = vmul.f32 0.5, %v578_v25  ;;  %vm652_vm15 = vweird.f32 %v1620_v61 }
 0x119   : > { %v1672_v1 = vpop.eup %1112  ;;  %v960_v48 = vadd.f32 %v1651_v32, %v924_v55  ;;  %v600_v50 = vsub.f32 1.5, %v599_v42  ;;  %v1694_v26 = vadd.f32 1e-06, %v513_v60  ;;  %v511_v23 = vmul.f32 %v435_v27, %v1375_v15 }
 0x11a   : > { %v958_v3 = vadd.f32 %v1651_v32, %v922_v28  ;;  %v621_v9 = vmul.f32 %v1617_v35, %v620_v44  ;;  %v580_v16 = vsub.f32 1.5, %v579_v43  ;;  %v647_v54 = vmul.f32 %v1672_v1, %v1620_v61  ;;  %v1696_v31 = vpop.eup %1114 }
 0x11b   : > { %992 = vst.msk [vmem:[%s1668_s25 + $0x10] sm:$0xff] %vm206_vm0, %v960_v48  ;;  %v601_v49 = vmul.f32 %v1622_v39, %v600_v50  ;;  %vm653_vm1 = vweird.f32 %v1672_v1  ;;  %v509_v38 = vmul.f32 %v429_v62, %v1375_v15  ;;  %1118 = vrsqrt.f32 %v1694_v26 }
 0x11c   : > { %990 = vst.msk [vmem:[%s1668_s25] sm:$0xff] %vm206_vm0, %v958_v3  ;;  %v625_v7 = vsel %vm1679_vm13, %v1617_v35, %v621_v9  ;;  %v581_v56 = vmul.f32 %v1629_v57, %v580_v16  ;;  %v648_v25 = vmul.f32 %v1672_v1, %v647_v54  ;;  %v627_v35 = vmul.f32 %v1696_v31, %v1627_v53  ;;  %vm1737_vm5 = vmor %vm652_vm15, %vm653_vm1 }
 0x11d   : > { %v891_v55 = vmul.f32 %v625_v7, %v1396_v47  ;;  %v605_v42 = vsel %vm604_vm2, %v1622_v39, %v601_v49  ;;  %v1722_v27 = vpop.eup %1116  ;;  %vm632_vm4 = vweird.f32 %v1627_v53  ;;  %v1741_v16 = vadd.f32 1e-06, %v511_v23 }
 0x11e   : > { %v889_v28 = vmul.f32 %v605_v42, %v1399_v51  ;;  %v585_v44 = vsel %vm584_vm3, %v1629_v57, %v581_v56  ;;  %v649_v43 = vmul.f32 0.5, %v648_v25  ;;  %v450_v47 = vpop.xlane.xlu1 %449  ;;  %v628_v60 = vmul.f32 %v1696_v31, %v627_v35 }
 0x11f   : > { %v927_v39 = vmul.f32 %v1634_v20, %v891_v55  ;;  %v887_v37 = vmul.f32 %v585_v44, %v1402_v52  ;;  %v444_v48 = vpop.xlane.xlu2 %443  ;;  %v438_v19 = vpop.xlane.xlu0 %437  ;;  %v607_v57 = vmul.f32 %v1722_v27, %v1661_v13  ;;  %v1746_v56 = vadd.f32 1e-06, %v509_v38 }
 0x120   : > { %v925_v62 = vmul.f32 %v1634_v20, %v889_v28  ;;  %v650_v51 = vsub.f32 1.5, %v649_v43  ;;  %v629_v9 = vmul.f32 0.5, %v628_v60  ;;  %vm633_vm6 = vweird.f32 %v1696_v31 }
 0x121   : > { %v963_v50 = vadd.f32 %v1651_v32, %v927_v39  ;;  %v923_v3 = vmul.f32 %v1634_v20, %v887_v37  ;;  %v608_v7 = vmul.f32 %v1722_v27, %v607_v57  ;;  %1120 = vrsqrt.f32 %v1741_v16  ;;  %v1753_v23 = vpop.eup %1118  ;;  %vm634_vm9 = vmor %vm632_vm4, %vm633_vm6 }
 0x122   : > { %v961_v54 = vadd.f32 %v1651_v32, %v925_v62  ;;  %v651_v49 = vmul.f32 %v1672_v1, %v650_v51  ;;  %v630_v25 = vsub.f32 1.5, %v629_v9  ;;  %vm612_vm7 = vweird.f32 %v1661_v13 }
 0x123   : > { %995 = vst.msk [vmem:[%s1668_s25 + $0x28] sm:$0xff] %vm206_vm0, %v963_v50  ;;  %v959_v61 = vadd.f32 %v1651_v32, %v923_v3  ;;  %v609_v42 = vmul.f32 0.5, %v608_v7  ;;  %1122 = vrsqrt.f32 %v1746_v56  ;;  %vm613_vm8 = vweird.f32 %v1722_v27 }
 0x124   : > { %993 = vst.msk [vmem:[%s1668_s25 + $0x18] sm:$0xff] %vm206_vm0, %v961_v54  ;;  %v655_v55 = vsel %vm1737_vm5, %v1672_v1, %v651_v49  ;;  %v631_v38 = vmul.f32 %v1696_v31, %v630_v25  ;;  %v677_v28 = vmul.f32 %v1753_v23, %v1694_v26  ;;  %v516_v44 = vmul.f32 %v450_v47, %v1375_v15  ;;  %vm614_vm11 = vmor %vm612_vm7, %vm613_vm8 }
 0x125   : > { %991 = vst.msk [vmem:[%s1668_s25 + $0x8] sm:$0xff] %vm206_vm0, %v959_v61  ;;  %v894_v35 = vmul.f32 %v655_v55, %v1422_v10  ;;  %v610_v1 = vsub.f32 1.5, %v609_v42  ;;  %v514_v43 = vmul.f32 %v444_v48, %v1375_v15  ;;  %v512_v39 = vmul.f32 %v438_v19, %v1375_v15 }
 0x126   : > { %v459_v37 = vpop.xlane.xlu1 %458  ;;  %v635_v60 = vsel %vm634_vm9, %v1696_v31, %v631_v38  ;;  %v678_v62 = vmul.f32 %v1753_v23, %v677_v28  ;;  %vm682_vm10 = vweird.f32 %v1694_v26  ;;  %v1781_v48 = vadd.f32 1e-06, %v516_v44 }
 0x127   : > { %v930_v10 = vmul.f32 %v1634_v20, %v894_v35  ;;  %v519_v51 = vmul.f32 %v459_v37, %v1375_v15  ;;  %v453_v57 = vpop.xlane.xlu2 %452  ;;  %v447_v50 = vpop.xlane.xlu0 %446  ;;  %v892_v53 = vmul.f32 %v635_v60, %v1425_v11  ;;  %v611_v47 = vmul.f32 %v1722_v27, %v610_v1 }
 0x128   : > { %v1783_v19 = vpop.eup %1120  ;;  %v679_v31 = vmul.f32 0.5, %v678_v62  ;;  %vm683_vm12 = vweird.f32 %v1753_v23  ;;  %v1791_v52 = vadd.f32 1e-06, %v514_v43  ;;  %v1799_v7 = vadd.f32 1e-06, %v512_v39 }
 0x129   : > { %v966_v3 = vadd.f32 %v1651_v32, %v930_v10  ;;  %v1793_v11 = vpop.eup %1122  ;;  %v928_v9 = vmul.f32 %v1634_v20, %v892_v53  ;;  %v615_v54 = vsel %vm614_vm11, %v1722_v27, %v611_v47  ;;  %v657_v49 = vmul.f32 %v1783_v19, %v1741_v16  ;;  %vm1811_vm13 = vmor %vm682_vm10, %vm683_vm12 }
 0x12a   : > { %v890_v13 = vmul.f32 %v615_v54, %v1409_v58  ;;  %v680_v61 = vsub.f32 1.5, %v679_v31  ;;  %v637_v25 = vmul.f32 %v1793_v11, %v1746_v56  ;;  %v1806_v55 = vadd.f32 1e-06, %v519_v51 }
 0x12b   : > { %998 = vst.msk [vmem:[%s1668_s25 + $0x40] sm:$0xff] %vm206_vm0, %v966_v3  ;;  %v964_v42 = vadd.f32 %v1651_v32, %v928_v9  ;;  %v658_v35 = vmul.f32 %v1783_v19, %v657_v49  ;;  %vm662_vm14 = vweird.f32 %v1741_v16  ;;  %1124 = vrsqrt.f32 %v1781_v48 }
 0x12c   : > { %v926_v58 = vmul.f32 %v1634_v20, %v890_v13  ;;  %v681_v38 = vmul.f32 %v1753_v23, %v680_v61  ;;  %v638_v28 = vmul.f32 %v1793_v11, %v637_v25  ;;  %1126 = vrsqrt.f32 %v1791_v52 }
 0x12d   : > { %996 = vst.msk [vmem:[%s1668_s25 + $0x30] sm:$0xff] %vm206_vm0, %v964_v42  ;;  %v659_v26 = vmul.f32 0.5, %v658_v35  ;;  %vm663_vm15 = vweird.f32 %v1783_v19  ;;  %vm642_vm1 = vweird.f32 %v1746_v56  ;;  %1128 = vrsqrt.f32 %v1799_v7 }
 0x12e   : > { %v962_v1 = vadd.f32 %v1651_v32, %v926_v58  ;;  %v685_v44 = vsel %vm1811_vm13, %v1753_v23, %v681_v38  ;;  %v639_v43 = vmul.f32 0.5, %v638_v28  ;;  %1130 = vrsqrt.f32 %v1806_v55  ;;  %v468_v39 = vpop.xlane.xlu1 %467  ;;  %vm664_vm6 = vmor %vm662_vm14, %vm663_vm15 }
 0x12f   : > { %v462_v37 = vpop.xlane.xlu2 %461  ;;  %v897_v10 = vmul.f32 %v685_v44, %v1443_v40  ;;  %v660_v60 = vsub.f32 1.5, %v659_v26  ;;  %vm643_vm2 = vweird.f32 %v1793_v11  ;;  %v517_v62 = vmul.f32 %v453_v57, %v1375_v15  ;;  %v456_v51 = vpop.xlane.xlu0 %455 }
 0x130   : > { %994 = vst.msk [vmem:[%s1668_s25 + $0x20] sm:$0xff] %vm206_vm0, %v962_v1  ;;  %v640_v53 = vsub.f32 1.5, %v639_v43  ;;  %vm712_vm3 = vweird.f32 %v1781_v48  ;;  %vm692_vm4 = vweird.f32 %v1791_v52  ;;  %v515_v23 = vmul.f32 %v447_v50, %v1375_v15  ;;  %vm644_vm7 = vmor %vm642_vm1, %vm643_vm2 }
 0x131   : > { %v1840_v47 = vpop.eup %1124  ;;  %v933_v3 = vmul.f32 %v1634_v20, %v897_v10  ;;  %v661_v40 = vmul.f32 %v1783_v19, %v660_v60  ;;  %vm742_vm5 = vweird.f32 %v1806_v55  ;;  %v522_v57 = vmul.f32 %v468_v39, %v1375_v15 }
 0x132   : > { %v520_v31 = vmul.f32 %v462_v37, %v1375_v15  ;;  %v1847_v9 = vpop.eup %1126  ;;  %v641_v50 = vmul.f32 %v1793_v11, %v640_v53  ;;  %v707_v54 = vmul.f32 %v1840_v47, %v1781_v48  ;;  %v1856_v49 = vadd.f32 1e-06, %v517_v62 }
 0x133   : > { %v518_v13 = vmul.f32 %v456_v51, %v1375_v15  ;;  %v1859_v61 = vpop.eup %1128  ;;  %v969_v25 = vadd.f32 %v1651_v32, %v933_v3  ;;  %v665_v42 = vsel %vm664_vm6, %v1783_v19, %v661_v40  ;;  %vm713_vm8 = vweird.f32 %v1840_v47 }
 0x134   : > { %v687_v16 = vmul.f32 %v1847_v9, %v1791_v52  ;;  %v1131_v27 = vpop.eup %1130  ;;  %v895_v35 = vmul.f32 %v665_v42, %v1446_v41  ;;  %v645_v58 = vsel %vm644_vm7, %v1793_v11, %v641_v50  ;;  %v708_v38 = vmul.f32 %v1840_v47, %v707_v54  ;;  %vm1893_vm11 = vmor %vm712_vm3, %vm713_vm8 }
 0x135   : > { %v667_v19 = vmul.f32 %v1859_v61, %v1799_v7  ;;  %1001 = vst.msk [vmem:[%s1668_s25 + $0x58] sm:$0xff] %vm206_vm0, %v969_v25  ;;  %v893_v56 = vmul.f32 %v645_v58, %v1430_v17  ;;  %v737_v26 = vmul.f32 %v1131_v27, %v1806_v55  ;;  %v1880_v1 = vadd.f32 1e-06, %v515_v23 }
 0x136   : > { %v688_v28 = vmul.f32 %v1847_v9, %v687_v16  ;;  %v931_v44 = vmul.f32 %v1634_v20, %v895_v35  ;;  %v709_v41 = vmul.f32 0.5, %v708_v38  ;;  %vm693_vm9 = vweird.f32 %v1847_v9 }
 0x137   : > { %v668_v11 = vmul.f32 %v1859_v61, %v667_v19  ;;  %v929_v43 = vmul.f32 %v1634_v20, %v893_v56  ;;  %v738_v37 = vmul.f32 %v1131_v27, %v737_v26  ;;  %1132 = vrsqrt.f32 %v1856_v49  ;;  %v1904_v54 = vpop.xlane.xlu0 %464  ;;  %vm1913_vm13 = vmor %vm692_vm4, %vm693_vm9 }
 0x138   : > { %v689_v39 = vmul.f32 0.5, %v688_v28  ;;  %v967_v17 = vadd.f32 %v1651_v32, %v931_v44  ;;  %v710_v10 = vsub.f32 1.5, %v709_v41  ;;  %vm743_vm10 = vweird.f32 %v1131_v27 }
 0x139   : > { %v669_v60 = vmul.f32 0.5, %v668_v11  ;;  %v965_v62 = vadd.f32 %v1651_v32, %v929_v43  ;;  %v739_v23 = vmul.f32 0.5, %v738_v37  ;;  %1134 = vrsqrt.f32 %v1880_v1  ;;  %vm1927_vm15 = vmor %vm742_vm5, %vm743_vm10 }
 0x13a   : > { %v690_v53 = vsub.f32 1.5, %v689_v39  ;;  %999 = vst.msk [vmem:[%s1668_s25 + $0x48] sm:$0xff] %vm206_vm0, %v967_v17  ;;  %v711_v3 = vmul.f32 %v1840_v47, %v710_v10  ;;  %vm673_vm12 = vweird.f32 %v1859_v61  ;;  %v1902_v50 = vadd.f32 1e-06, %v522_v57  ;;  %v471_v57 = vpop.xlane.xlu2 %470 }
 0x13b   : > { %v670_v40 = vsub.f32 1.5, %v669_v60  ;;  %997 = vst.msk [vmem:[%s1668_s25 + $0x38] sm:$0xff] %vm206_vm0, %v965_v62  ;;  %vm672_vm14 = vweird.f32 %v1799_v7  ;;  %v740_v42 = vsub.f32 1.5, %v739_v23  ;;  %v1918_v16 = vadd.f32 1e-06, %v520_v31  ;;  %v477_v31 = vpop.xlane.xlu1 %476 }
 0x13c   : > { %v691_v48 = vmul.f32 %v1847_v9, %v690_v53  ;;  %v715_v35 = vsel %vm1893_vm11, %v1840_v47, %v711_v3  ;;  %1136 = vrsqrt.f32 %v1902_v50  ;;  %v1932_v7 = vadd.f32 1e-06, %v518_v13  ;;  %vm674_vm1 = vmor %vm672_vm14, %vm673_vm12 }
 0x13d   : > { %v671_v58 = vmul.f32 %v1859_v61, %v670_v40  ;;  %v1934_v38 = vpop.eup %1132  ;;  %v900_v19 = vmul.f32 %v715_v35, %v1464_v8  ;;  %v741_v55 = vmul.f32 %v1131_v27, %v740_v42  ;;  %1138 = vrsqrt.f32 %v1918_v16 }
 0x13e   : > { %v695_v47 = vsel %vm1913_vm13, %v1847_v9, %v691_v48  ;;  %v717_v28 = vmul.f32 %v1934_v38, %v1856_v49  ;;  %vm722_vm2 = vweird.f32 %v1856_v49  ;;  %vm702_vm3 = vweird.f32 %v1880_v1 }
 0x13f   : > { %v898_v56 = vmul.f32 %v695_v47, %v1467_v63  ;;  %v675_v13 = vsel %vm674_vm1, %v1859_v61, %v671_v58  ;;  %v1947_v26 = vpop.eup %1134  ;;  %v936_v8 = vmul.f32 %v1634_v20, %v900_v19  ;;  %v745_v9 = vsel %vm1927_vm15, %v1131_v27, %v741_v55  ;;  %v1983_v40 = vpop.xlane.xlu0 %473 }
 0x140   : > { %v896_v44 = vmul.f32 %v675_v13, %v1451_v2  ;;  %v903_v63 = vmul.f32 %v745_v9, %v1485_v12  ;;  %v718_v61 = vmul.f32 %v1934_v38, %v717_v28  ;;  %v697_v11 = vmul.f32 %v1947_v26, %v1880_v1 }
 0x141   : > { %v934_v41 = vmul.f32 %v1634_v20, %v898_v56  ;;  %v972_v2 = vadd.f32 %v1651_v32, %v936_v8  ;;  %vm772_vm4 = vweird.f32 %v1902_v50  ;;  %1140 = vrsqrt.f32 %v1932_v7 }
 0x142   : > { %v932_v43 = vmul.f32 %v1634_v20, %v896_v44  ;;  %v1964_v27 = vpop.eup %1136  ;;  %v939_v39 = vmul.f32 %v1634_v20, %v903_v63  ;;  %v719_v37 = vmul.f32 0.5, %v718_v61  ;;  %v698_v17 = vmul.f32 %v1947_v26, %v697_v11  ;;  %v480_v35 = vpop.xlane.xlu2 %479 }
 0x143   : > { %v970_v12 = vadd.f32 %v1651_v32, %v934_v41  ;;  %v1969_v10 = vpop.eup %1138  ;;  %1004 = vst.msk [vmem:[%s1668_s25 + $0x70] sm:$0xff] %vm206_vm0, %v972_v2  ;;  %vm723_vm5 = vweird.f32 %v1934_v38  ;;  %v767_v62 = vmul.f32 %v1964_v27, %v1902_v50  ;;  %vm752_vm6 = vweird.f32 %v1918_v16  ;;  %v486_v47 = vpop.xlane.xlu1 %485 }
 0x144   : > { %v968_v60 = vadd.f32 %v1651_v32, %v932_v43  ;;  %v975_v51 = vadd.f32 %v1651_v32, %v939_v39  ;;  %v720_v53 = vsub.f32 1.5, %v719_v37  ;;  %v699_v23 = vmul.f32 0.5, %v698_v17  ;;  %vm724_vm9 = vmor %vm722_vm2, %vm723_vm5 }
 0x145   : > { %1002 = vst.msk [vmem:[%s1668_s25 + $0x60] sm:$0xff] %vm206_vm0, %v970_v12  ;;  %v747_v3 = vmul.f32 %v1969_v10, %v1918_v16  ;;  %vm703_vm7 = vweird.f32 %v1947_v26  ;;  %v768_v48 = vmul.f32 %v1964_v27, %v767_v62  ;;  %v525_v25 = vmul.f32 %v477_v31, %v1375_v15 }
 0x146   : > { %1000 = vst.msk [vmem:[%s1668_s25 + $0x50] sm:$0xff] %vm206_vm0, %v968_v60  ;;  %v523_v42 = vmul.f32 %v471_v57, %v1375_v15  ;;  %v721_v58 = vmul.f32 %v1934_v38, %v720_v53  ;;  %v700_v52 = vsub.f32 1.5, %v699_v23  ;;  %vm773_vm8 = vweird.f32 %v1964_v27  ;;  %vm704_vm10 = vmor %vm702_vm3, %vm703_vm7 }
 0x147   : > { %1007 = vst.msk [vmem:[%s1668_s25 + $0x88] sm:$0xff] %vm206_vm0, %v975_v51  ;;  %v748_v19 = vmul.f32 %v1969_v10, %v747_v3  ;;  %v1141_v55 = vpop.eup %1140  ;;  %v769_v31 = vmul.f32 0.5, %v768_v48  ;;  %v2000_v56 = vadd.f32 1e-06, %v525_v25  ;;  %v521_v13 = vmul.f32 %v1904_v54, %v1375_v15  ;;  %vm2021_vm11 = vmor %vm772_vm4, %vm773_vm8  ;;  %v2045_v51 = vpop.xlane.xlu0 %482 }
 0x148   : > { %v2002_v57 = vadd.f32 1e-06, %v523_v42  ;;  %v725_v28 = vsel %vm724_vm9, %v1934_v38, %v721_v58  ;;  %v701_v8 = vmul.f32 %v1947_v26, %v700_v52  ;;  %v727_v9 = vmul.f32 %v1141_v55, %v1932_v7 }
 0x149   : > { %v749_v44 = vmul.f32 0.5, %v748_v19  ;;  %v901_v41 = vmul.f32 %v725_v28, %v1488_v33  ;;  %v770_v49 = vsub.f32 1.5, %v769_v31  ;;  %1142 = vrsqrt.f32 %v2000_v56 }
 0x14a   : > { %v528_v63 = vmul.f32 %v486_v47, %v1375_v15  ;;  %v705_v54 = vsel %vm704_vm10, %v1947_v26, %v701_v8  ;;  %vm753_vm12 = vweird.f32 %v1969_v10  ;;  %v728_v1 = vmul.f32 %v1141_v55, %v727_v9  ;;  %v489_v23 = vpop.xlane.xlu2 %488 }
 0x14b   : > { %v750_v33 = vsub.f32 1.5, %v749_v44  ;;  %v937_v61 = vmul.f32 %v1634_v20, %v901_v41  ;;  %v899_v11 = vmul.f32 %v705_v54, %v1472_v4  ;;  %v771_v2 = vmul.f32 %v1964_v27, %v770_v49  ;;  %vm754_vm14 = vmor %vm752_vm6, %vm753_vm12  ;;  %v495_v47 = vpop.xlane.xlu1 %494 }
 0x14c   : > { %1144 = vrsqrt.f32 %v2002_v57  ;;  %v729_v50 = vmul.f32 0.5, %v728_v1  ;;  %vm733_vm13 = vweird.f32 %v1141_v55  ;;  %v2031_v43 = vadd.f32 1e-06, %v521_v13 }
 0x14d   : > { %v751_v26 = vmul.f32 %v1969_v10, %v750_v33  ;;  %v973_v12 = vadd.f32 %v1651_v32, %v937_v61  ;;  %v935_v39 = vmul.f32 %v1634_v20, %v899_v11  ;;  %v775_v37 = vsel %vm2021_vm11, %v1964_v27, %v771_v2 }
 0x14e   : > { %v2040_v4 = vadd.f32 1e-06, %v528_v63  ;;  %v906_v17 = vmul.f32 %v775_v37, %v1506_v18  ;;  %v730_v62 = vsub.f32 1.5, %v729_v50  ;;  %1146 = vrsqrt.f32 %v2031_v43 }
 0x14f   : > { %v755_v60 = vsel %vm754_vm14, %v1969_v10, %v751_v26  ;;  %v2047_v53 = vpop.eup %1142  ;;  %1005 = vst.msk [vmem:[%s1668_s25 + $0x78] sm:$0xff] %vm206_vm0, %v973_v12  ;;  %v971_v27 = vadd.f32 %v1651_v32, %v935_v39  ;;  %vm732_vm15 = vweird.f32 %v1932_v7  ;;  %vm802_vm2 = vweird.f32 %v2000_v56  ;;  %v2113_v26 = vpop.xlane.xlu0 %491 }
 0x150   : > { %v904_v16 = vmul.f32 %v755_v60, %v1509_v59  ;;  %1148 = vrsqrt.f32 %v2040_v4  ;;  %v942_v18 = vmul.f32 %v1634_v20, %v906_v17  ;;  %v731_v3 = vmul.f32 %v1141_v55, %v730_v62  ;;  %vm734_vm1 = vmor %vm732_vm15, %vm733_vm13 }
 0x151   : > { %v797_v10 = vmul.f32 %v2047_v53, %v2000_v56  ;;  %1003 = vst.msk [vmem:[%s1668_s25 + $0x68] sm:$0xff] %vm206_vm0, %v971_v27  ;;  %v526_v59 = vmul.f32 %v480_v35, %v1375_v15  ;;  %v524_v42 = vmul.f32 %v1983_v40, %v1375_v15  ;;  %vm782_vm3 = vweird.f32 %v2002_v57 }
 0x152   : > { %v2058_v48 = vpop.eup %1144  ;;  %v940_v25 = vmul.f32 %v1634_v20, %v904_v16  ;;  %v978_v7 = vadd.f32 %v1651_v32, %v942_v18  ;;  %v735_v58 = vsel %vm734_vm1, %v1141_v55, %v731_v3  ;;  %vm803_vm4 = vweird.f32 %v2047_v53  ;;  %v498_v39 = vpop.xlane.xlu2 %497 }
 0x153   : > { %v798_v52 = vmul.f32 %v2047_v53, %v797_v10  ;;  %v777_v19 = vmul.f32 %v2058_v48, %v2002_v57  ;;  %v902_v13 = vmul.f32 %v735_v58, %v1493_v34  ;;  %v2075_v35 = vadd.f32 1e-06, %v526_v59  ;;  %vm2103_vm7 = vmor %vm802_vm2, %vm803_vm4 }
 0x154   : > { %v976_v31 = vadd.f32 %v1651_v32, %v940_v25  ;;  %v2077_v28 = vpop.eup %1146  ;;  %1010 = vst.msk [vmem:[%s1668_s25 + $0xa0] sm:$0xff] %vm206_vm0, %v978_v7  ;;  %v2083_v8 = vadd.f32 1e-06, %v524_v42  ;;  %vm762_vm5 = vweird.f32 %v2031_v43  ;;  %v531_v41 = vmul.f32 %v495_v47, %v1375_v15 }
 0x155   : > { %v799_v40 = vmul.f32 0.5, %v798_v52  ;;  %v778_v55 = vmul.f32 %v2058_v48, %v777_v19  ;;  %v938_v34 = vmul.f32 %v1634_v20, %v902_v13  ;;  %v757_v9 = vmul.f32 %v2077_v28, %v2031_v43 }
 0x156   : > { %v2085_v44 = vpop.eup %1148  ;;  %1008 = vst.msk [vmem:[%s1668_s25 + $0x90] sm:$0xff] %vm206_vm0, %v976_v31  ;;  %1150 = vrsqrt.f32 %v2075_v35  ;;  %vm832_vm6 = vweird.f32 %v2040_v4  ;;  %vm783_vm8 = vweird.f32 %v2058_v48  ;;  %vm763_vm9 = vweird.f32 %v2077_v28 }
 0x157   : > { %v800_v49 = vsub.f32 1.5, %v799_v40  ;;  %v779_v63 = vmul.f32 0.5, %v778_v55  ;;  %v827_v54 = vmul.f32 %v2085_v44, %v2040_v4  ;;  %v974_v38 = vadd.f32 %v1651_v32, %v938_v34  ;;  %vm784_vm12 = vmor %vm782_vm3, %vm783_vm8 }
 0x158   : > { %v758_v1 = vmul.f32 %v2077_v28, %v757_v9  ;;  %1152 = vrsqrt.f32 %v2083_v8  ;;  %vm833_vm10 = vweird.f32 %v2085_v44  ;;  %v2118_v50 = vadd.f32 1e-06, %v531_v41  ;;  %vm764_vm14 = vmor %vm762_vm5, %vm763_vm9 }
 0x159   : > { %v801_v61 = vmul.f32 %v2047_v53, %v800_v49  ;;  %v780_v11 = vsub.f32 1.5, %v779_v63  ;;  %v828_v2 = vmul.f32 %v2085_v44, %v827_v54  ;;  %1006 = vst.msk [vmem:[%s1668_s25 + $0x80] sm:$0xff] %vm206_vm0, %v974_v38  ;;  %v529_v12 = vmul.f32 %v489_v23, %v1375_v15  ;;  %vm2147_vm13 = vmor %vm832_vm6, %vm833_vm10 }
 0x15a   : > { %v759_v56 = vmul.f32 0.5, %v758_v1  ;;  %vm812_vm11 = vweird.f32 %v2075_v35  ;;  %1154 = vrsqrt.f32 %v2118_v50  ;;  %v532_v10 = vmul.f32 %v498_v39, %v1375_v15 }
 0x15b   : > { %v805_v37 = vsel %vm2103_vm7, %v2047_v53, %v801_v61  ;;  %v781_v17 = vmul.f32 %v2058_v48, %v780_v11  ;;  %v829_v60 = vmul.f32 0.5, %v828_v2  ;;  %v527_v53 = vmul.f32 %v2045_v51, %v1375_v15 }
 0x15c   : > { %v2126_v62 = vpop.eup %1150  ;;  %v909_v27 = vmul.f32 %v805_v37, %v1527_v24  ;;  %v760_v16 = vsub.f32 1.5, %v759_v56  ;;  %vm792_vm15 = vweird.f32 %v2083_v8  ;;  %vm862_vm1 = vweird.f32 %v2118_v50 }
 0x15d   : > { %v785_v23 = vsel %vm784_vm12, %v2058_v48, %v781_v17  ;;  %v830_v18 = vsub.f32 1.5, %v829_v60  ;;  %v807_v3 = vmul.f32 %v2126_v62, %v2075_v35  ;;  %v2151_v48 = vadd.f32 1e-06, %v529_v12 }
 0x15e   : > { %v1153_v24 = vpop.eup %1152  ;;  %v945_v25 = vmul.f32 %v1634_v20, %v909_v27  ;;  %v907_v57 = vmul.f32 %v785_v23, %v1530_v21  ;;  %v761_v59 = vmul.f32 %v2077_v28, %v760_v16  ;;  %vm813_vm2 = vweird.f32 %v2126_v62 }
 0x15f   : > { %v831_v21 = vmul.f32 %v2085_v44, %v830_v18  ;;  %v808_v42 = vmul.f32 %v2126_v62, %v807_v3  ;;  %v787_v7 = vmul.f32 %v1153_v24, %v2083_v8  ;;  %1156 = vrsqrt.f32 %v2151_v48  ;;  %vm814_vm5 = vmor %vm812_vm11, %vm813_vm2 }
 0x160   : > { %v981_v4 = vadd.f32 %v1651_v32, %v945_v25  ;;  %v943_v58 = vmul.f32 %v1634_v20, %v907_v57  ;;  %v765_v52 = vsel %vm764_vm14, %v2077_v28, %v761_v59  ;;  %v1155_v13 = vpop.eup %1154  ;;  %v2175_v28 = vadd.f32 1e-06, %v527_v53 }
 0x161   : > { %v905_v43 = vmul.f32 %v765_v52, %v1514_v6  ;;  %v835_v19 = vsel %vm2147_vm13, %v2085_v44, %v831_v21  ;;  %v809_v47 = vmul.f32 0.5, %v808_v42  ;;  %v788_v31 = vmul.f32 %v1153_v24, %v787_v7  ;;  %v501_v44 = vpop.xlane.xlu0 %500 }
 0x162   : > { %1013 = vst.msk [vmem:[%s1668_s25 + $0xb8] sm:$0xff] %vm206_vm0, %v981_v4  ;;  %v979_v40 = vadd.f32 %v1651_v32, %v943_v58  ;;  %v912_v55 = vmul.f32 %v835_v19, %v1548_v30  ;;  %v857_v41 = vmul.f32 %v1155_v13, %v2118_v50  ;;  %vm793_vm3 = vweird.f32 %v1153_v24 }
 0x163   : > { %v941_v34 = vmul.f32 %v1634_v20, %v905_v43  ;;  %v810_v6 = vsub.f32 1.5, %v809_v47  ;;  %v789_v9 = vmul.f32 0.5, %v788_v31  ;;  %vm863_vm4 = vweird.f32 %v1155_v13  ;;  %vm794_vm6 = vmor %vm792_vm15, %vm793_vm3 }
 0x164   : > { %1011 = vst.msk [vmem:[%s1668_s25 + $0xa8] sm:$0xff] %vm206_vm0, %v979_v40  ;;  %v948_v49 = vmul.f32 %v1634_v20, %v912_v55  ;;  %1158 = vrsqrt.f32 %v2175_v28  ;;  %v858_v38 = vmul.f32 %v1155_v13, %v857_v41  ;;  %v2190_v61 = vadd.f32 1e-06, %v532_v10  ;;  %vm2213_vm7 = vmor %vm862_vm1, %vm863_vm4 }
 0x165   : > { %v977_v30 = vadd.f32 %v1651_v32, %v941_v34  ;;  %v811_v63 = vmul.f32 %v2126_v62, %v810_v6  ;;  %v790_v54 = vsub.f32 1.5, %v789_v9  ;;  %v1157_v33 = vpop.eup %1156  ;;  %v530_v11 = vmul.f32 %v2113_v26, %v1375_v15 }
 0x166   : > { %v984_v1 = vadd.f32 %v1651_v32, %v948_v49  ;;  %v533_v2 = vmul.f32 %v501_v44, %v1375_v15  ;;  %v859_v39 = vmul.f32 0.5, %v858_v38  ;;  %v837_v37 = vmul.f32 %v1157_v33, %v2151_v48 }
 0x167   : > { %1009 = vst.msk [vmem:[%s1668_s25 + $0x98] sm:$0xff] %vm206_vm0, %v977_v30  ;;  %v815_v56 = vsel %vm814_vm5, %v2126_v62, %v811_v63  ;;  %v791_v12 = vmul.f32 %v1153_v24, %v790_v54  ;;  %1160 = vrsqrt.f32 %v2190_v61  ;;  %v2206_v60 = vadd.f32 1e-06, %v530_v11 }
 0x168   : > { %1016 = vst.msk [vmem:[%s1668_s25 + $0xd0] sm:$0xff] %vm206_vm0, %v984_v1  ;;  %v910_v35 = vmul.f32 %v815_v56, %v1551_v45  ;;  %v860_v15 = vsub.f32 1.5, %v859_v39  ;;  %v838_v17 = vmul.f32 %v1157_v33, %v837_v37  ;;  %v2217_v8 = vadd.f32 1e-06, %v533_v2 }
 0x169   : > { %v795_v26 = vsel %vm794_vm6, %v1153_v24, %v791_v12  ;;  %vm842_vm8 = vweird.f32 %v2151_v48  ;;  %vm843_vm9 = vweird.f32 %v1157_v33  ;;  %1162 = vrsqrt.f32 %v2206_v60 }
 0x16a   : > { %v1159_v62 = vpop.eup %1158  ;;  %v946_v27 = vmul.f32 %v1634_v20, %v910_v35  ;;  %v908_v16 = vmul.f32 %v795_v26, %v1535_v22  ;;  %v861_v53 = vmul.f32 %v1155_v13, %v860_v15  ;;  %v839_v23 = vmul.f32 0.5, %v838_v17  ;;  %vm844_vm10 = vmor %vm842_vm8, %vm843_vm9  ;;  %v1167_v15 = vld [vmem:[%s2278_s2] ss:$0 sm:$0xff] }
 0x16b   : > { %v817_v18 = vmul.f32 %v1159_v62, %v2175_v28  ;;  %1164 = vrsqrt.f32 %v2217_v8  ;;  %vm823_vm11 = vweird.f32 %v1159_v62  ;;  %vm822_vm12 = vweird.f32 %v2175_v28 }
 0x16c   : > { %v982_v3 = vadd.f32 %v1651_v32, %v946_v27  ;;  %v944_v22 = vmul.f32 %v1634_v20, %v908_v16  ;;  %v865_v50 = vsel %vm2213_vm7, %v1155_v13, %v861_v53  ;;  %v840_v10 = vsub.f32 1.5, %v839_v23  ;;  %vm824_vm13 = vmor %vm822_vm12, %vm823_vm11 }
 0x16d   : > { %v818_v24 = vmul.f32 %v1159_v62, %v817_v18  ;;  %v1161_v25 = vpop.eup %1160  ;;  %v915_v59 = vmul.f32 %v865_v50, %v1569_v36  ;;  %vm872_vm14 = vweird.f32 %v2190_v61  ;;  %vm852_vm4 = vweird.f32 %v2206_v60 }
 0x16e   : > { %1014 = vst.msk [vmem:[%s1668_s25 + $0xc0] sm:$0xff] %vm206_vm0, %v982_v3  ;;  %v980_v57 = vadd.f32 %v1651_v32, %v944_v22  ;;  %v841_v51 = vmul.f32 %v1157_v33, %v840_v10  ;;  %v867_v42 = vmul.f32 %v1161_v25, %v2190_v61  ;;  %vm873_vm15 = vweird.f32 %v1161_v25 }
 0x16f   : > { %v819_v21 = vmul.f32 0.5, %v818_v24  ;;  %v951_v7 = vmul.f32 %v1634_v20, %v915_v59  ;;  %v1163_v43 = vpop.eup %1162  ;;  %vm874_vm1 = vmor %vm872_vm14, %vm873_vm15  ;;  %vm882_vm6 = vweird.f32 %v2217_v8 }
 0x170   : > { %1012 = vst.msk [vmem:[%s1668_s25 + $0xb0] sm:$0xff] %vm206_vm0, %v980_v57  ;;  %v845_v4 = vsel %vm844_vm10, %v1157_v33, %v841_v51  ;;  %v868_v52 = vmul.f32 %v1161_v25, %v867_v42  ;;  %v847_v40 = vmul.f32 %v1163_v43, %v2206_v60  ;;  %vm853_vm2 = vweird.f32 %v1163_v43 }
 0x171   : > { %v820_v58 = vsub.f32 1.5, %v819_v21  ;;  %v987_v36 = vadd.f32 %v1651_v32, %v951_v7  ;;  %v913_v19 = vmul.f32 %v845_v4, %v1572_v0  ;;  %v1165_v47 = vpop.eup %1164  ;;  %vm854_vm5 = vmor %vm852_vm4, %vm853_vm2 }
 0x172   : > { %v869_v13 = vmul.f32 0.5, %v868_v52  ;;  %v877_v55 = vmul.f32 %v1165_v47, %v2217_v8  ;;  %v848_v0 = vmul.f32 %v1163_v43, %v847_v40  ;;  %vm883_vm3 = vweird.f32 %v1165_v47 }
 0x173   : > { %v821_v31 = vmul.f32 %v1159_v62, %v820_v58  ;;  %1019 = vst.msk [vmem:[%s1668_s25 + $0xe8] sm:$0xff] %vm206_vm0, %v987_v36  ;;  %v949_v48 = vmul.f32 %v1634_v20, %v913_v19  ;;  %vm884_vm7 = vmor %vm882_vm6, %vm883_vm3 }
 0x174   : > { %v870_v6 = vsub.f32 1.5, %v869_v13  ;;  %v878_v41 = vmul.f32 %v1165_v47, %v877_v55  ;;  %v849_v49 = vmul.f32 0.5, %v848_v0 }
 0x175   : > { %v825_v34 = vsel %vm824_vm13, %v1159_v62, %v821_v31  ;;  %v985_v9 = vadd.f32 %v1651_v32, %v949_v48 }
 0x176   : > { %v911_v28 = vmul.f32 %v825_v34, %v1556_v46  ;;  %v871_v44 = vmul.f32 %v1161_v25, %v870_v6  ;;  %v879_v63 = vmul.f32 0.5, %v878_v41  ;;  %v850_v38 = vsub.f32 1.5, %v849_v49 }
 0x177   : > { %1017 = vst.msk [vmem:[%s1668_s25 + $0xd8] sm:$0xff] %vm206_vm0, %v985_v9 }
 0x178   : > { %v947_v30 = vmul.f32 %v1634_v20, %v911_v28  ;;  %v875_v54 = vsel %vm874_vm1, %v1161_v25, %v871_v44  ;;  %v880_v61 = vsub.f32 1.5, %v879_v63  ;;  %v851_v46 = vmul.f32 %v1163_v43, %v850_v38  ;;  %v1166_v20 = vld [vmem:[%s2277_s1] ss:$0 sm:$0xff] }
 0x179   : > { %v916_v1 = vmul.f32 %v875_v54, %v1589_v29 }
 0x17a   : > { %v983_v33 = vadd.f32 %v1651_v32, %v947_v30  ;;  %v881_v2 = vmul.f32 %v1165_v47, %v880_v61  ;;  %v855_v29 = vsel %vm854_vm5, %v1163_v43, %v851_v46 }
 0x17b   : > { %v952_v11 = vmul.f32 %v1166_v20, %v916_v1  ;;  %v914_v12 = vmul.f32 %v855_v29, %v1577_v5 }
 0x17c   : > { %1015 = vst.msk [vmem:[%s1668_s25 + $0xc8] sm:$0xff] %vm206_vm0, %v983_v33  ;;  %v885_v39 = vsel %vm884_vm7, %v1165_v47, %v881_v2 }
 0x17d   : > { %v988_v56 = vadd.f32 %v1651_v32, %v952_v11  ;;  %v917_v37 = vmul.f32 %v885_v39, %v1592_v14  ;;  %v950_v35 = vmul.f32 %v1166_v20, %v914_v12 }
 0x17f   : > { %1020 = vst.msk [vmem:[%s1668_s25 + $0xf0] sm:$0xff] %vm206_vm0, %v988_v56  ;;  %v953_v26 = vmul.f32 %v1166_v20, %v917_v37  ;;  %v986_v17 = vadd.f32 %v1167_v15, %v950_v35 }
 0x181   : > { %v989_v60 = vadd.f32 %v1167_v15, %v953_v26  ;;  %1018 = vst.msk [vmem:[%s1668_s25 + $0xe0] sm:$0xff] %vm206_vm0, %v986_v17 }
 0x183   : > { %1021 = vst.msk [vmem:[%s1668_s25 + $0xf8] sm:$0xff] %vm206_vm0, %v989_v60 }
 0x184 PF: > { %s13_s12 = sadd.s32 1, %s1174_s12  }
 0x185   : > { %p10_p4 = scmp.ge.s32.totalorder %s13_s12, 4  }
 0x187   :  { %12 = sbr.rel (!%p10_p4) target bundleno = 1 (0x1), region = 62 }

</bundles_post_ra>
